<compile_context>
chip_gen: v7x
topology: tpu7x:2x2x1
jax: 0.10.0
libtpu: 0.0.40
codegen_flags: <defaults>
</compile_context>

<pallas_src>
import functools

import jax
import jax.numpy as jnp
from jax.experimental import pallas as pl
from jax.experimental.pallas import tpu as pltpu


def _round_up(n, m):
    return ((n + m - 1) // m) * m


def _ceil_div(a, b):
    return -(-a // b)


def _choose_batch_tile(B, tile_b):
    """Pick a batch tile so the grid has >=2 (even) steps when B allows it."""
    b8 = _round_up(B, 8)
    tb = _round_up(min(tile_b, b8), 8)
    n = _ceil_div(b8, tb)
    if n == 1 and b8 >= 16:
        # Split so v7x's second TensorCore gets work and the x/out pipeline
        # has something to overlap.
        tb = _round_up(_ceil_div(b8, 2), 8)
    elif n > 1 and n % 2 == 1:
        # Prefer an even step count so the two v7x cores get equal work.
        tb = _round_up(_ceil_div(b8, n + 1), 8)
    bp = _round_up(B, tb)
    return tb, bp


def _critic_kernel(x_ref, w1_ref, w2_ref, w3_ref, b12_ref, b3_ref, o_ref,
                   *, hidden_size):
    wdt = w1_ref.dtype                      # bf16 in the perf config, f32 otherwise
    b12 = b12_ref[...]                      # f32 (2, Hp): row0 = b1, row1 = b2

    # ---- linin: x @ W1 + b1, then LeakyReLU(0.05) ----
    h = jnp.dot(x_ref[...].astype(wdt), w1_ref[...],
                preferred_element_type=jnp.float32)
    h = h + b12[0:1, :]
    h = jnp.maximum(h, 0.05 * h)            # LeakyReLU, slope 0.05 (mul+max)

    # ---- hid: h @ W2 + b2 ----
    h = jnp.dot(h.astype(wdt), w2_ref[...],
                preferred_element_type=jnp.float32)
    h = h + b12[1:2, :]

    # ---- LayerNorm over the REAL hidden width (eps = 1e-5, biased var) ----
    # Padded columns of h are exactly zero (zero-padded W1/W2 cols, zero bias
    # pad), so single-pass sums over the padded width equal real-width sums.
    inv_h = 1.0 / float(hidden_size)
    s = jnp.sum(h, axis=-1, keepdims=True)
    ss = jnp.sum(h * h, axis=-1, keepdims=True)
    mean = s * inv_h
    var = ss * inv_h - mean * mean
    hn = (h - mean) * jax.lax.rsqrt(var + 1e-5)
    # gamma/beta are folded into W3'/b3' outside the kernel; padded rows of W3'
    # are zero, so the garbage in padded columns of hn never contributes.

    # ---- out: tanh(hn @ W3' + b3') ----
    y = jnp.dot(hn.astype(wdt), w3_ref[...],
                preferred_element_type=jnp.float32) + b3_ref[...]
    o_ref[...] = jnp.tanh(y).astype(o_ref.dtype)


def critic_net_values(x, params, *, tile_b=512, weights_dtype=jnp.bfloat16):
    """x: (B, inputs_size) f32.  params: w* as (in, out), b*/gamma/beta as (1, n)."""
    B, in_size = x.shape
    hidden_size = params["w1"].shape[1]
    out_size = params["w3"].shape[1]
    f32 = jnp.float32
    LANE = 128

    hp = _round_up(hidden_size, LANE)       # lane-dense hidden width
    tb, bp = _choose_batch_tile(B, tile_b)
    n_steps = bp // tb

    # Fold LayerNorm affine into the final linear (in f32, before quantizing):
    #   (hn*gamma + beta) @ W3 + b3 == hn @ (gamma^T * W3) + (beta @ W3 + b3)
    w3_fused = params["gamma"].reshape(hidden_size, 1) * params["w3"]
    b3_fused = params["beta"] @ params["w3"] + params["b3"]

    # Zero-pad weights to lane-dense shapes; store them in weights_dtype
    # (bf16 by default -> half the DMA bytes, native bf16 MXU; f32 accumulate).
    w1 = jnp.zeros((in_size, hp), f32).at[:, :hidden_size].set(params["w1"])
    w2 = jnp.zeros((hp, hp), f32).at[:hidden_size, :hidden_size].set(params["w2"])
    w3 = jnp.zeros((hp, out_size), f32).at[:hidden_size, :].set(w3_fused)
    w1 = w1.astype(weights_dtype)
    w2 = w2.astype(weights_dtype)
    w3 = w3.astype(weights_dtype)
    # Biases stay f32 (tiny) and are packed: b1/b2 in one (2, Hp) operand.
    b12 = jnp.zeros((2, hp), f32)
    b12 = b12.at[0, :hidden_size].set(params["b1"][0])
    b12 = b12.at[1, :hidden_size].set(params["b2"][0])
    b3 = b3_fused.astype(f32).reshape(1, out_size)

    # Pad batch up to a multiple of the batch tile.
    xp = x if bp == B else jnp.zeros((bp, in_size), f32).at[:B].set(x)

    kernel = functools.partial(_critic_kernel, hidden_size=hidden_size)

    wbytes = jnp.dtype(weights_dtype).itemsize
    flops = 2 * bp * (in_size * hp + hp * hp + hp * out_size)
    bytes_accessed = (4 * bp * (in_size + out_size)
                      + wbytes * (in_size * hp + hp * hp + hp * out_size)
                      + 4 * (2 * hp + out_size))
    cost = pl.CostEstimate(flops=flops,
                           transcendentals=bp * (out_size + 1),
                           bytes_accessed=bytes_accessed)

    # VMEM budget from the actual resident set (weights + biases) plus the
    # double-buffered x/out tiles and f32 intermediates, with headroom.
    weight_bytes = wbytes * (in_size * hp + hp * hp + hp * out_size)
    bias_bytes = 4 * (2 * hp + out_size)
    io_bytes = 4 * 2 * tb * (in_size + out_size)      # 2-deep x / out tiles
    h_scratch = 4 * tb * hp * 3                        # f32 h / hn temporaries

    def _vmem_limit(n_weight_bufs):
        est = n_weight_bufs * (weight_bytes + bias_bytes) + io_bytes + h_scratch
        est = int(est * 1.5) + (2 << 20)
        # Clamp: >= v5e scoped default headroom, <= v7x physical VMEM.
        return min(max(est, 16 << 20), 64 << 20)

    def _run(single_buffer_weights):
        wkw = ({"pipeline_mode": pl.Buffered(1)}
               if single_buffer_weights else {})
        in_specs = [
            pl.BlockSpec((tb, in_size), lambda i: (i, 0)),            # x tile
            pl.BlockSpec((in_size, hp), lambda i: (0, 0), **wkw),     # W1
            pl.BlockSpec((hp, hp), lambda i: (0, 0), **wkw),          # W2
            pl.BlockSpec((hp, out_size), lambda i: (0, 0), **wkw),    # W3'
            pl.BlockSpec((2, hp), lambda i: (0, 0), **wkw),           # b1/b2
            pl.BlockSpec((1, out_size), lambda i: (0, 0), **wkw),     # b3'
        ]
        return pl.pallas_call(
            kernel,
            out_shape=jax.ShapeDtypeStruct((bp, out_size), f32),
            grid=(n_steps,),
            in_specs=in_specs,
            out_specs=pl.BlockSpec((tb, out_size), lambda i: (i, 0)),
            compiler_params=pltpu.CompilerParams(
                dimension_semantics=("parallel",),
                vmem_limit_bytes=_vmem_limit(1 if single_buffer_weights else 2)),
            cost_estimate=cost,
        )(xp, w1, w2, w3, b12, b3)

    try:
        out = jax.block_until_ready(_run(single_buffer_weights=True))
    except Exception:
        # TODO(synk): pipeline_mode=pl.Buffered(1) unsupported on this jax
        # build; fall back to default (double-buffered) resident weights.
        out = _run(single_buffer_weights=False)

    return out[:B, :out_size]


def init_params(key, inputs_size, hidden_size, out_size):
    ks = jax.random.split(key, 8)

    def unif(k, shape, fan_in, scale=1.0):
        bound = scale / jnp.sqrt(float(fan_in))
        return jax.random.uniform(k, shape, jnp.float32, -bound, bound)

    return {
        "w1": unif(ks[0], (inputs_size, hidden_size), inputs_size),
        "b1": unif(ks[1], (1, hidden_size), inputs_size),
        "w2": unif(ks[2], (hidden_size, hidden_size), hidden_size),
        "b2": unif(ks[3], (1, hidden_size), hidden_size),
        # Non-trivial affine so the gamma/beta -> W3/b3 fold is exercised.
        "gamma": 1.0 + 0.2 * jax.random.uniform(ks[4], (1, hidden_size), jnp.float32, -1.0, 1.0),
        "beta": 0.1 * jax.random.uniform(ks[5], (1, hidden_size), jnp.float32, -1.0, 1.0),
        "w3": unif(ks[6], (hidden_size, out_size), hidden_size),
        "b3": unif(ks[7], (1, out_size), hidden_size),
    }


def reference(x, p):
    h = x @ p["w1"] + p["b1"]
    h = jnp.where(h >= 0, h, 0.05 * h)
    h = h @ p["w2"] + p["b2"]
    mean = jnp.mean(h, axis=-1, keepdims=True)
    var = jnp.mean(jnp.square(h - mean), axis=-1, keepdims=True)
    h = (h - mean) / jnp.sqrt(var + 1e-5)
    h = h * p["gamma"] + p["beta"]
    return jnp.tanh(h @ p["w3"] + p["b3"])


if __name__ == "__main__":
    key = jax.random.PRNGKey(0)
    k_x, k_p = jax.random.split(key)

    batch, inputs_size, hidden_size, out_size = 8, 32, 64, 16
    x = jax.random.normal(k_x, (batch, inputs_size), jnp.float32)
    params = init_params(k_p, inputs_size, hidden_size, out_size)

    ref = reference(x, params)

    # Strict numerics check: f32-stored weights make the kernel bit-comparable
    # to the f32 reference at tight tolerance.
    out_f32 = critic_net_values(x, params, weights_dtype=jnp.float32)
    jax.block_until_ready(out_f32)
    assert out_f32.shape == (batch, out_size)
    assert jnp.allclose(out_f32, ref, atol=1e-4, rtol=1e-4)

    # Performance config (default): bf16-stored weights, f32 accumulation.
    # Looser tolerance accounts only for bf16 weight/activation quantization.
    out = critic_net_values(x, params)
    jax.block_until_ready(out)
    assert out.shape == (batch, out_size)
    assert jnp.allclose(out, ref, atol=3e-2, rtol=3e-2)

    print("KERNEL_OK")
</pallas_src>

<mosaic_0001>
module attributes {stable_mosaic.version = 11 : i64} {
  func.func @_critic_kernel(%arg0: i32, %arg1: memref<8x32xf32, #tpu.memory_space<vmem>>, %arg2: memref<32x128xf32, #tpu.memory_space<vmem>>, %arg3: memref<128x128xf32, #tpu.memory_space<vmem>>, %arg4: memref<128x16xf32, #tpu.memory_space<vmem>>, %arg5: memref<2x128xf32, #tpu.memory_space<vmem>>, %arg6: memref<1x16xf32, #tpu.memory_space<vmem>>, %arg7: memref<8x16xf32, #tpu.memory_space<vmem>>) attributes {dimension_semantics = [#tpu.dimension_semantics<parallel>], iteration_bounds = array<i64: 1>, scalar_prefetch = 0 : i64, scratch_operands = 0 : i64, tpu.core_type = #tpu.core_type<tc>, window_params = [{transform_indices = @transform_0, window_bounds = array<i64: 8, 32>}, {pipeline_mode = #tpu.pipeline_mode<synchronous>, transform_indices = @transform_1, window_bounds = array<i64: 32, 128>}, {pipeline_mode = #tpu.pipeline_mode<synchronous>, transform_indices = @transform_2, window_bounds = array<i64: 128, 128>}, {pipeline_mode = #tpu.pipeline_mode<synchronous>, transform_indices = @transform_3, window_bounds = array<i64: 128, 16>}, {pipeline_mode = #tpu.pipeline_mode<synchronous>, transform_indices = @transform_4, window_bounds = array<i64: 2, 128>}, {pipeline_mode = #tpu.pipeline_mode<synchronous>, transform_indices = @transform_5, window_bounds = array<i64: 1, 16>}, {transform_indices = @transform_6, window_bounds = array<i64: 8, 16>}]} {
    %c0 = arith.constant 0 : index
    %c0_0 = arith.constant 0 : index
    %0 = vector.load %arg5[%c0, %c0_0] : memref<2x128xf32, #tpu.memory_space<vmem>>, vector<2x128xf32>
    %c0_1 = arith.constant 0 : index
    %c0_2 = arith.constant 0 : index
    %1 = vector.load %arg1[%c0_1, %c0_2] : memref<8x32xf32, #tpu.memory_space<vmem>>, vector<8x32xf32>
    %c0_3 = arith.constant 0 : index
    %c0_4 = arith.constant 0 : index
    %2 = vector.load %arg2[%c0_3, %c0_4] : memref<32x128xf32, #tpu.memory_space<vmem>>, vector<32x128xf32>
    %cst = arith.constant dense<0.000000e+00> : vector<8x128xf32>
    %3 = tpu.matmul %1, %2, %cst {dimension_numbers = #tpu.dot_dimension_numbers<[1], [0], [0], [1], [0, 0, 1, 1], [], []>} : vector<8x32xf32>, vector<32x128xf32>, vector<8x128xf32> -> vector<8x128xf32>
    %4 = vector.extract_strided_slice %0 {offsets = [0, 0], sizes = [1, 128], strides = [1, 1]} : vector<2x128xf32> to vector<1x128xf32>
    %5 = vector.broadcast %4 : vector<1x128xf32> to vector<8x128xf32>
    %6 = arith.addf %3, %5 : vector<8x128xf32>
    %cst_5 = arith.constant 5.000000e-02 : f32
    %7 = vector.broadcast %cst_5 : f32 to vector<8x128xf32>
    %8 = arith.mulf %7, %6 : vector<8x128xf32>
    %9 = arith.maximumf %6, %8 : vector<8x128xf32>
    %c0_6 = arith.constant 0 : index
    %c0_7 = arith.constant 0 : index
    %10 = vector.load %arg3[%c0_6, %c0_7] : memref<128x128xf32, #tpu.memory_space<vmem>>, vector<128x128xf32>
    %cst_8 = arith.constant dense<0.000000e+00> : vector<8x128xf32>
    %11 = tpu.matmul %9, %10, %cst_8 {dimension_numbers = #tpu.dot_dimension_numbers<[1], [0], [0], [1], [0, 0, 1, 1], [], []>} : vector<8x128xf32>, vector<128x128xf32>, vector<8x128xf32> -> vector<8x128xf32>
    %12 = vector.extract_strided_slice %0 {offsets = [1, 0], sizes = [1, 128], strides = [1, 1]} : vector<2x128xf32> to vector<1x128xf32>
    %13 = vector.broadcast %12 : vector<1x128xf32> to vector<8x128xf32>
    %14 = arith.addf %11, %13 : vector<8x128xf32>
    %cst_9 = arith.constant dense<0.000000e+00> : vector<8xf32>
    %15 = vector.multi_reduction <add>, %14, %cst_9 [1] : vector<8x128xf32> to vector<8xf32>
    %16 = vector.shape_cast %15 : vector<8xf32> to vector<8x1xf32>
    %17 = arith.mulf %14, %14 : vector<8x128xf32>
    %cst_10 = arith.constant dense<0.000000e+00> : vector<8xf32>
    %18 = vector.multi_reduction <add>, %17, %cst_10 [1] : vector<8x128xf32> to vector<8xf32>
    %19 = vector.shape_cast %18 : vector<8xf32> to vector<8x1xf32>
    %cst_11 = arith.constant 1.562500e-02 : f32
    %20 = vector.broadcast %cst_11 : f32 to vector<8x1xf32>
    %21 = arith.mulf %16, %20 : vector<8x1xf32>
    %cst_12 = arith.constant 1.562500e-02 : f32
    %22 = vector.broadcast %cst_12 : f32 to vector<8x1xf32>
    %23 = arith.mulf %19, %22 : vector<8x1xf32>
    %24 = arith.mulf %21, %21 : vector<8x1xf32>
    %25 = arith.subf %23, %24 : vector<8x1xf32>
    %26 = vector.broadcast %21 : vector<8x1xf32> to vector<8x128xf32>
    %27 = arith.subf %14, %26 : vector<8x128xf32>
    %cst_13 = arith.constant 9.99999974E-6 : f32
    %28 = vector.broadcast %cst_13 : f32 to vector<8x1xf32>
    %29 = arith.addf %25, %28 : vector<8x1xf32>
    %30 = math.rsqrt %29 : vector<8x1xf32>
    %31 = vector.broadcast %30 : vector<8x1xf32> to vector<8x128xf32>
    %32 = arith.mulf %27, %31 : vector<8x128xf32>
    %c0_14 = arith.constant 0 : index
    %c0_15 = arith.constant 0 : index
    %33 = vector.load %arg4[%c0_14, %c0_15] : memref<128x16xf32, #tpu.memory_space<vmem>>, vector<128x16xf32>
    %cst_16 = arith.constant dense<0.000000e+00> : vector<8x16xf32>
    %34 = tpu.matmul %32, %33, %cst_16 {dimension_numbers = #tpu.dot_dimension_numbers<[1], [0], [0], [1], [0, 0, 1, 1], [], []>} : vector<8x128xf32>, vector<128x16xf32>, vector<8x16xf32> -> vector<8x16xf32>
    %c0_17 = arith.constant 0 : index
    %c0_18 = arith.constant 0 : index
    %35 = vector.load %arg6[%c0_17, %c0_18] : memref<1x16xf32, #tpu.memory_space<vmem>>, vector<1x16xf32>
    %36 = vector.broadcast %35 : vector<1x16xf32> to vector<8x16xf32>
    %37 = arith.addf %34, %36 : vector<8x16xf32>
    %38 = math.tanh %37 : vector<8x16xf32>
    %c0_19 = arith.constant 0 : index
    %c0_20 = arith.constant 0 : index
    %39 = vector.load %arg7[%c0_19, %c0_20] : memref<8x16xf32, #tpu.memory_space<vmem>>, vector<8x16xf32>
    tpu.vector_store %arg7[%c0_19, %c0_20], %38 {strides = array<i32>} : memref<8x16xf32, #tpu.memory_space<vmem>>, vector<8x16xf32>,
    return
  }
  func.func @transform_0(%arg0: i32) -> (i32, i32) {
    %c0_i32 = arith.constant 0 : i32
    %c0_i32_0 = arith.constant 0 : i32
    return %arg0, %c0_i32 : i32, i32
  }
  func.func @transform_1(%arg0: i32) -> (i32, i32) {
    %c0_i32 = arith.constant 0 : i32
    %c0_i32_0 = arith.constant 0 : i32
    %c0_i32_1 = arith.constant 0 : i32
    return %c0_i32, %c0_i32_0 : i32, i32
  }
  func.func @transform_2(%arg0: i32) -> (i32, i32) {
    %c0_i32 = arith.constant 0 : i32
    %c0_i32_0 = arith.constant 0 : i32
    %c0_i32_1 = arith.constant 0 : i32
    return %c0_i32, %c0_i32_0 : i32, i32
  }
  func.func @transform_3(%arg0: i32) -> (i32, i32) {
    %c0_i32 = arith.constant 0 : i32
    %c0_i32_0 = arith.constant 0 : i32
    %c0_i32_1 = arith.constant 0 : i32
    return %c0_i32, %c0_i32_0 : i32, i32
  }
  func.func @transform_4(%arg0: i32) -> (i32, i32) {
    %c0_i32 = arith.constant 0 : i32
    %c0_i32_0 = arith.constant 0 : i32
    %c0_i32_1 = arith.constant 0 : i32
    return %c0_i32, %c0_i32_0 : i32, i32
  }
  func.func @transform_5(%arg0: i32) -> (i32, i32) {
    %c0_i32 = arith.constant 0 : i32
    %c0_i32_0 = arith.constant 0 : i32
    %c0_i32_1 = arith.constant 0 : i32
    return %c0_i32, %c0_i32_0 : i32, i32
  }
  func.func @transform_6(%arg0: i32) -> (i32, i32) {
    %c0_i32 = arith.constant 0 : i32
    %c0_i32_0 = arith.constant 0 : i32
    return %arg0, %c0_i32 : i32, i32
  }
}

module attributes {stable_mosaic.version = 11 : i64} {
  func.func @_critic_kernel(%arg0: i32, %arg1: memref<8x32xf32, #tpu.memory_space<vmem>>, %arg2: memref<32x128xf32, #tpu.memory_space<vmem>>, %arg3: memref<128x128xf32, #tpu.memory_space<vmem>>, %arg4: memref<128x16xf32, #tpu.memory_space<vmem>>, %arg5: memref<2x128xf32, #tpu.memory_space<vmem>>, %arg6: memref<1x16xf32, #tpu.memory_space<vmem>>, %arg7: memref<8x16xf32, #tpu.memory_space<vmem>>) attributes {dimension_semantics = [#tpu.dimension_semantics<parallel>], iteration_bounds = array<i64: 1>, scalar_prefetch = 0 : i64, scratch_operands = 0 : i64, tpu.core_type = #tpu.core_type<tc>, window_params = [{transform_indices = @transform_0, window_bounds = array<i64: 8, 32>}, {pipeline_mode = #tpu.pipeline_mode<synchronous>, transform_indices = @transform_1, window_bounds = array<i64: 32, 128>}, {pipeline_mode = #tpu.pipeline_mode<synchronous>, transform_indices = @transform_2, window_bounds = array<i64: 128, 128>}, {pipeline_mode = #tpu.pipeline_mode<synchronous>, transform_indices = @transform_3, window_bounds = array<i64: 128, 16>}, {pipeline_mode = #tpu.pipeline_mode<synchronous>, transform_indices = @transform_4, window_bounds = array<i64: 2, 128>}, {pipeline_mode = #tpu.pipeline_mode<synchronous>, transform_indices = @transform_5, window_bounds = array<i64: 1, 16>}, {transform_indices = @transform_6, window_bounds = array<i64: 8, 16>}]} {
    %c0 = arith.constant 0 : index
    %c0_0 = arith.constant 0 : index
    %0 = vector.load %arg5[%c0, %c0_0] : memref<2x128xf32, #tpu.memory_space<vmem>>, vector<2x128xf32>
    %c0_1 = arith.constant 0 : index
    %c0_2 = arith.constant 0 : index
    %1 = vector.load %arg1[%c0_1, %c0_2] : memref<8x32xf32, #tpu.memory_space<vmem>>, vector<8x32xf32>
    %c0_3 = arith.constant 0 : index
    %c0_4 = arith.constant 0 : index
    %2 = vector.load %arg2[%c0_3, %c0_4] : memref<32x128xf32, #tpu.memory_space<vmem>>, vector<32x128xf32>
    %cst = arith.constant dense<0.000000e+00> : vector<8x128xf32>
    %3 = tpu.matmul %1, %2, %cst {dimension_numbers = #tpu.dot_dimension_numbers<[1], [0], [0], [1], [0, 0, 1, 1], [], []>} : vector<8x32xf32>, vector<32x128xf32>, vector<8x128xf32> -> vector<8x128xf32>
    %4 = vector.extract_strided_slice %0 {offsets = [0, 0], sizes = [1, 128], strides = [1, 1]} : vector<2x128xf32> to vector<1x128xf32>
    %5 = vector.broadcast %4 : vector<1x128xf32> to vector<8x128xf32>
    %6 = arith.addf %3, %5 : vector<8x128xf32>
    %cst_5 = arith.constant 5.000000e-02 : f32
    %7 = vector.broadcast %cst_5 : f32 to vector<8x128xf32>
    %8 = arith.mulf %7, %6 : vector<8x128xf32>
    %9 = arith.maximumf %6, %8 : vector<8x128xf32>
    %c0_6 = arith.constant 0 : index
    %c0_7 = arith.constant 0 : index
    %10 = vector.load %arg3[%c0_6, %c0_7] : memref<128x128xf32, #tpu.memory_space<vmem>>, vector<128x128xf32>
    %cst_8 = arith.constant dense<0.000000e+00> : vector<8x128xf32>
    %11 = tpu.matmul %9, %10, %cst_8 {dimension_numbers = #tpu.dot_dimension_numbers<[1], [0], [0], [1], [0, 0, 1, 1], [], []>} : vector<8x128xf32>, vector<128x128xf32>, vector<8x128xf32> -> vector<8x128xf32>
    %12 = vector.extract_strided_slice %0 {offsets = [1, 0], sizes = [1, 128], strides = [1, 1]} : vector<2x128xf32> to vector<1x128xf32>
    %13 = vector.broadcast %12 : vector<1x128xf32> to vector<8x128xf32>
    %14 = arith.addf %11, %13 : vector<8x128xf32>
    %cst_9 = arith.constant dense<0.000000e+00> : vector<8xf32>
    %15 = vector.multi_reduction <add>, %14, %cst_9 [1] : vector<8x128xf32> to vector<8xf32>
    %16 = vector.shape_cast %15 : vector<8xf32> to vector<8x1xf32>
    %17 = arith.mulf %14, %14 : vector<8x128xf32>
    %cst_10 = arith.constant dense<0.000000e+00> : vector<8xf32>
    %18 = vector.multi_reduction <add>, %17, %cst_10 [1] : vector<8x128xf32> to vector<8xf32>
    %19 = vector.shape_cast %18 : vector<8xf32> to vector<8x1xf32>
    %cst_11 = arith.constant 1.562500e-02 : f32
    %20 = vector.broadcast %cst_11 : f32 to vector<8x1xf32>
    %21 = arith.mulf %16, %20 : vector<8x1xf32>
    %cst_12 = arith.constant 1.562500e-02 : f32
    %22 = vector.broadcast %cst_12 : f32 to vector<8x1xf32>
    %23 = arith.mulf %19, %22 : vector<8x1xf32>
    %24 = arith.mulf %21, %21 : vector<8x1xf32>
    %25 = arith.subf %23, %24 : vector<8x1xf32>
    %26 = vector.broadcast %21 : vector<8x1xf32> to vector<8x128xf32>
    %27 = arith.subf %14, %26 : vector<8x128xf32>
    %cst_13 = arith.constant 9.99999974E-6 : f32
    %28 = vector.broadcast %cst_13 : f32 to vector<8x1xf32>
    %29 = arith.addf %25, %28 : vector<8x1xf32>
    %30 = math.rsqrt %29 : vector<8x1xf32>
    %31 = vector.broadcast %30 : vector<8x1xf32> to vector<8x128xf32>
    %32 = arith.mulf %27, %31 : vector<8x128xf32>
    %c0_14 = arith.constant 0 : index
    %c0_15 = arith.constant 0 : index
    %33 = vector.load %arg4[%c0_14, %c0_15] : memref<128x16xf32, #tpu.memory_space<vmem>>, vector<128x16xf32>
    %cst_16 = arith.constant dense<0.000000e+00> : vector<8x16xf32>
    %34 = tpu.matmul %32, %33, %cst_16 {dimension_numbers = #tpu.dot_dimension_numbers<[1], [0], [0], [1], [0, 0, 1, 1], [], []>} : vector<8x128xf32>, vector<128x16xf32>, vector<8x16xf32> -> vector<8x16xf32>
    %c0_17 = arith.constant 0 : index
    %c0_18 = arith.constant 0 : index
    %35 = vector.load %arg6[%c0_17, %c0_18] : memref<1x16xf32, #tpu.memory_space<vmem>>, vector<1x16xf32>
    %36 = vector.broadcast %35 : vector<1x16xf32> to vector<8x16xf32>
    %37 = arith.addf %34, %36 : vector<8x16xf32>
    %38 = math.tanh %37 : vector<8x16xf32>
    %c0_19 = arith.constant 0 : index
    %c0_20 = arith.constant 0 : index
    %39 = vector.load %arg7[%c0_19, %c0_20] : memref<8x16xf32, #tpu.memory_space<vmem>>, vector<8x16xf32>
    tpu.vector_store %arg7[%c0_19, %c0_20], %38 {strides = array<i32>} : memref<8x16xf32, #tpu.memory_space<vmem>>, vector<8x16xf32>,
    return
  }
  func.func @transform_0(%arg0: i32) -> (i32, i32) {
    %c0_i32 = arith.constant 0 : i32
    %c0_i32_0 = arith.constant 0 : i32
    return %arg0, %c0_i32 : i32, i32
  }
  func.func @transform_1(%arg0: i32) -> (i32, i32) {
    %c0_i32 = arith.constant 0 : i32
    %c0_i32_0 = arith.constant 0 : i32
    %c0_i32_1 = arith.constant 0 : i32
    return %c0_i32, %c0_i32_0 : i32, i32
  }
  func.func @transform_2(%arg0: i32) -> (i32, i32) {
    %c0_i32 = arith.constant 0 : i32
    %c0_i32_0 = arith.constant 0 : i32
    %c0_i32_1 = arith.constant 0 : i32
    return %c0_i32, %c0_i32_0 : i32, i32
  }
  func.func @transform_3(%arg0: i32) -> (i32, i32) {
    %c0_i32 = arith.constant 0 : i32
    %c0_i32_0 = arith.constant 0 : i32
    %c0_i32_1 = arith.constant 0 : i32
    return %c0_i32, %c0_i32_0 : i32, i32
  }
  func.func @transform_4(%arg0: i32) -> (i32, i32) {
    %c0_i32 = arith.constant 0 : i32
    %c0_i32_0 = arith.constant 0 : i32
    %c0_i32_1 = arith.constant 0 : i32
    return %c0_i32, %c0_i32_0 : i32, i32
  }
  func.func @transform_5(%arg0: i32) -> (i32, i32) {
    %c0_i32 = arith.constant 0 : i32
    %c0_i32_0 = arith.constant 0 : i32
    %c0_i32_1 = arith.constant 0 : i32
    return %c0_i32, %c0_i32_0 : i32, i32
  }
  func.func @transform_6(%arg0: i32) -> (i32, i32) {
    %c0_i32 = arith.constant 0 : i32
    %c0_i32_0 = arith.constant 0 : i32
    return %arg0, %c0_i32 : i32, i32
  }
}

</mosaic_0001>

<bundles_post_ra>
// kernel: tpu_custom_call.1
= control target key start
LH: loop header
LB: loop body
LE: loop exit
PB: predicated region body
PF: predicated region fallthrough
CT: control target
= control target key end

     0   :  { %11 = vsyncpa [#allocation3], 0  ;;  %s765_s0 = inlined_call_operand.vmem [shape: f32[8,32], index: 0, kind: input, shape index: {}]   ;;  %s766_s1 = inlined_call_operand.hbm [shape: f32[32,128], index: 1, kind: input, shape index: {}]   ;;  %s767_s2 = inlined_call_operand.vmem [shape: f32[128,128], index: 2, kind: input, shape index: {}]   ;;  %s768_s3 = inlined_call_operand.vmem [shape: f32[128,16], index: 3, kind: input, shape index: {}]   ;;  %s769_s4 = inlined_call_operand.vmem [shape: f32[2,128], index: 4, kind: input, shape index: {}]   ;;  %s770_s5 = inlined_call_operand.vmem [shape: f32[1,16], index: 5, kind: input, shape index: {}]   ;;  %s771_s6 = inlined_call_operand.hbm [shape: f32[8,16], index: 6, kind: output, shape index: {}]  }
   0x1   :  { %12 = vsyncpa [#allocation4], 0  ;;  %s573_s21 = smov [#allocation2]   ;;  %s525_s25 = scalar_lea.hbm %s766_s1, 512 }
   0x2   :  { %s20_s22 = sshll.u32 %s573_s21, 4  ;;  %p526_p0 = scmp.ne.s32.totalorder %s766_s1, %s525_s25  ;;  %s21_s22 = int_to_ptr.vmem [resolvable:$true] %s20_s22 }
   0x3   :  { %p529_p1 = scmp.lt.u32.totalorder %s525_s25, %s766_s1 }
   0x5   :  { %p531_p2 = pnand %p529_p1, %p526_p0 }
   0x7   :  { %534 = shalt.err (!%p531_p2)
}
   0x8   :  { %s535_s30 = scalar_lea.vmem %s21_s22, 512  ;;  %p540_p4 = scmp.lt.s32.totalorder %s21_s22, %s21_s22 }
   0x9   :  { %p536_p3 = scmp.ne.s32.totalorder %s21_s22, %s535_s30  ;;  %p541_p5 = scmp.lt.s32.totalorder %s535_s30, %s535_s30 }
   0xb   :  { %p542_p6 = por %p541_p5, %p540_p4 }
   0xd   :  { %p543_p7 = pnand %p542_p6, %p536_p3 }
   0xf   :  { %546 = shalt.err (!%p543_p7)
}
  0x10   :  { %s574_s7 = smov 128   ;;  %s575_s8 = smov 8  }
  0x11   :  { %26 = dma.hbm_to_vmem [thread:$0]  %s766_s1, 512, %s21_s22, [#allocation3], %s574_s7, %s574_s7, %s575_s8  }
  0x12   :  { %569 = dma.done.wait [#allocation3], 512  }
  0x13   :  { %570 = vsyncadd [#allocation3], 4294966784  ;;  %v576_v0 = vmov 0.0|0.0   ;;  %vm577_vm0 = vmmov 0   ;;  %v578_v1 = vmov 0.0   ;;  %v40_v2 = vld [vmem:[#allocation2] sm:$0xff]  ;;  %v44_v33 = vlaneseq }
  0x14   :  { %460 = vmatprep.subr.bf16.mxu0 %v576_v0  ;;  %387 = vmatprep.mubr.msk.f32.mxu0 %vm577_vm0, %v578_v1  ;;  %v41_v3 = vld [vmem:[#allocation2 + $0x8] sm:$0xff]  ;;  %v42_v4 = vld [vmem:[#allocation2 + $0x10] sm:$0xff]  ;;  %v43_v6 = vld [vmem:[#allocation2 + $0x18] sm:$0xff]  ;;  %vm48_vm1 = vcmask 261120   ;;  %vm321_vm2 = vcmask 130048  }
  0x15   :  { %466 = vmatprep.subr.bf16.mxu1 %v576_v0  ;;  %422 = vmatprep.mubr.msk.f32.mxu1 %vm577_vm0, %v578_v1  ;;  %v461_v5 = vpack.c.bf16 %v41_v3, %v40_v2  ;;  %v124_v7 = vld [vmem:[%s767_s2] sm:$0xff]  ;;  %v125_v8 = vld [vmem:[%s767_s2 + $0x8] sm:$0xff]  ;;  %v126_v9 = vld [vmem:[%s767_s2 + $0x10] sm:$0xff]  ;;  %v464_v11 = vpack.c.bf16 %v43_v6, %v42_v4  ;;  %v45_v34 = vshrl.u32 %v44_v33, 7 }
  0x16   :  { %v127_v10 = vld [vmem:[%s767_s2 + $0x18] sm:$0xff]  ;;  %v467_v12 = vpack.c.bf16 %v125_v8, %v124_v7  ;;  %v128_v14 = vld [vmem:[%s767_s2 + $0x20] sm:$0xff]  ;;  %v129_v15 = vld [vmem:[%s767_s2 + $0x28] sm:$0xff] }
  0x17   :  { %462 = vmatpush3.bf16.msra.mxu0 %v461_v5  ;;  %v470_v13 = vpack.c.bf16 %v127_v10, %v126_v9  ;;  %v39_v16 = vld [vmem:[%s765_s0] sm:$0xff]  ;;  %v473_v17 = vpack.c.bf16 %v129_v15, %v128_v14  ;;  %v130_v18 = vld [vmem:[%s767_s2 + $0x30] sm:$0xff]  ;;  %v131_v19 = vld [vmem:[%s767_s2 + $0x38] sm:$0xff]  ;;  %v46_v35 = vsub.s32 0, %v45_v34  ;;  %v142_v49 = vsub.s32 1, %v45_v34 }
  0x18   :  { %463 = vmatprep.subr.bf16.mxu0 %v576_v0  ;;  %468 = vmatpush3.bf16.msra.mxu1 %v467_v12  ;;  %v476_v20 = vpack.c.bf16 %v131_v19, %v130_v18  ;;  %v132_v21 = vld [vmem:[%s767_s2 + $0x40] sm:$0xff]  ;;  %v133_v22 = vld [vmem:[%s767_s2 + $0x48] sm:$0xff]  ;;  %v134_v24 = vld [vmem:[%s767_s2 + $0x50] sm:$0xff] }
  0x19   :  { %469 = vmatprep.subr.bf16.mxu1 %v576_v0  ;;  %v479_v23 = vpack.c.bf16 %v133_v22, %v132_v21  ;;  %v135_v25 = vld [vmem:[%s767_s2 + $0x58] sm:$0xff]  ;;  %v136_v27 = vld [vmem:[%s767_s2 + $0x60] sm:$0xff]  ;;  %v137_v28 = vld [vmem:[%s767_s2 + $0x68] sm:$0xff] }
  0x1a   :  { %v482_v26 = vpack.c.bf16 %v135_v25, %v134_v24  ;;  %v485_v29 = vpack.c.bf16 %v137_v28, %v136_v27  ;;  %v138_v30 = vld [vmem:[%s767_s2 + $0x70] sm:$0xff]  ;;  %v139_v31 = vld [vmem:[%s767_s2 + $0x78] sm:$0xff]  ;;  %v38_v36 = vld [vmem:[%s769_s4] sm:$0x3] }
  0x1b   :  { %465 = vmatpush3.bf16.msra.mxu0 %v464_v11  ;;  %v488_v32 = vpack.c.bf16 %v139_v31, %v138_v30  ;;  %v47_v37 = vrot.slane %v38_v36, %v46_v35  ;;  %v227_v43 = vld [vmem:[%s768_s3] sm:$0xff]  ;;  %v228_v44 = vld [vmem:[%s768_s3 + $0x8] sm:$0xff]  ;;  %v229_v45 = vld [vmem:[%s768_s3 + $0x10] sm:$0xff]  ;;  %v143_v50 = vrot.slane %v38_v36, %v142_v49 }
  0x1c   :  { %490 = vmatprep.subr.bf16.mxu0 %v576_v0  ;;  %471 = vmatpush3.bf16.msra.mxu1 %v470_v13  ;;  %v491_v46 = vpack.c.bf16 %v228_v44, %v227_v43  ;;  %v230_v47 = vld [vmem:[%s768_s3 + $0x18] sm:$0xff]  ;;  %v231_v55 = vld [vmem:[%s768_s3 + $0x20] sm:$0xff]  ;;  %v232_v56 = vld [vmem:[%s768_s3 + $0x28] sm:$0xff] }
  0x1d   :  { %472 = vmatprep.subr.bf16.mxu1 %v576_v0  ;;  %v494_v48 = vpack.c.bf16 %v230_v47, %v229_v45  ;;  %v497_v57 = vpack.c.bf16 %v232_v56, %v231_v55  ;;  %v233_v58 = vld [vmem:[%s768_s3 + $0x30] sm:$0xff]  ;;  %v234_v59 = vld [vmem:[%s768_s3 + $0x38] sm:$0xff]  ;;  %v235_v61 = vld [vmem:[%s768_s3 + $0x40] sm:$0xff] }
  0x1e   :  { %388 = vmatmul.mubr.msk.f32.vlgmr.msra.gmra.mrb[0].mxu0 %vm48_vm1, %v39_v16  ;;  %v500_v60 = vpack.c.bf16 %v234_v59, %v233_v58  ;;  %v236_v62 = vld [vmem:[%s768_s3 + $0x48] sm:$0xff]  ;;  %v238_v2 = vld [vmem:[%s768_s3 + $0x58] sm:$0xff]  ;;  %v239_v4 = vld [vmem:[%s768_s3 + $0x60] sm:$0xff] }
  0x1f   :  { %457 = vmatprep.mubr.msk.f32.mxu0 %vm577_vm0, %v578_v1  ;;  %492 = vmatpush3.bf16.msra.mxu0 %v491_v46  ;;  %v503_v63 = vpack.c.bf16 %v236_v62, %v235_v61  ;;  %v237_v1 = vld [vmem:[%s768_s3 + $0x50] sm:$0xff]  ;;  %v240_v5 = vld [vmem:[%s768_s3 + $0x68] sm:$0xff]  ;;  %v242_v8 = vld [vmem:[%s768_s3 + $0x78] sm:$0xff] }
  0x20   :  { %474 = vmatpush3.bf16.msra.mxu1 %v473_v17  ;;  %493 = vmatprep.subr.bf16.mxu0 %v576_v0  ;;  %v506_v3 = vpack.c.bf16 %v238_v2, %v237_v1  ;;  %v509_v6 = vpack.c.bf16 %v240_v5, %v239_v4  ;;  %v241_v7 = vld [vmem:[%s768_s3 + $0x70] sm:$0xff]  ;;  %s579_s3 = smov [#allocation5]  }
  0x21   :  { %475 = vmatprep.subr.bf16.mxu1 %v576_v0  ;;  %v512_v9 = vpack.c.bf16 %v242_v8, %v241_v7  ;;  %s329_s4 = sshll.u32 %s579_s3, 4  ;;  %s330_s4 = int_to_ptr.vmem [resolvable:$true] %s329_s4 }
  0x22   :  { %s547_s25 = scalar_lea.vmem %s330_s4, 128  ;;  %p552_p9 = scmp.lt.s32.totalorder %s330_s4, %s330_s4 }
  0x23   :  { %495 = vmatpush3.bf16.msra.mxu0 %v494_v48  ;;  %p548_p8 = scmp.ne.s32.totalorder %s330_s4, %s547_s25  ;;  %p553_p10 = scmp.lt.s32.totalorder %s547_s25, %s547_s25 }
  0x24   :  { %477 = vmatpush3.bf16.msra.mxu1 %v476_v20  ;;  %496 = vmatprep.subr.bf16.mxu0 %v576_v0  ;;  %v339_v20 = vld [vmem:[%s770_s5] ss:$0 sm:$0xff] }
  0x25   :  { %478 = vmatprep.subr.bf16.mxu1 %v576_v0  ;;  %p554_p11 = por %p553_p10, %p552_p9 }
  0x27   :  { %498 = vmatpush3.bf16.msra.mxu0 %v497_v57  ;;  %p555_p12 = pnand %p554_p11, %p548_p8 }
  0x28   :  { %480 = vmatpush3.bf16.msra.mxu1 %v479_v23  ;;  %499 = vmatprep.subr.bf16.mxu0 %v576_v0 }
  0x29   :  { %481 = vmatprep.subr.bf16.mxu1 %v576_v0 }
  0x2b   :  { %501 = vmatpush3.bf16.msra.mxu0 %v500_v60 }
  0x2c   :  { %483 = vmatpush3.bf16.msra.mxu1 %v482_v26  ;;  %502 = vmatprep.subr.bf16.mxu0 %v576_v0 }
  0x2d   :  { %484 = vmatprep.subr.bf16.mxu1 %v576_v0 }
  0x2f   :  { %504 = vmatpush3.bf16.msra.mxu0 %v503_v63 }
  0x30   :  { %486 = vmatpush3.bf16.msra.mxu1 %v485_v29  ;;  %505 = vmatprep.subr.bf16.mxu0 %v576_v0 }
  0x31   :  { %487 = vmatprep.subr.bf16.mxu1 %v576_v0 }
  0x33   :  { %507 = vmatpush3.bf16.msra.mxu0 %v506_v3 }
  0x34   :  { %489 = vmatpush3.bf16.msra.mxu1 %v488_v32  ;;  %508 = vmatprep.subr.bf16.mxu0 %v576_v0 }
  0x37   :  { %510 = vmatpush3.bf16.msra.mxu0 %v509_v6 }
  0x38   :  { %511 = vmatprep.subr.bf16.mxu0 %v576_v0 }
  0x3b   :  { %513 = vmatpush3.bf16.msra.mxu0 %v512_v9 }
  0xf1   :  { %v118_v38 = vpop.f32.mrb[0].mxu0 }
  0xf2   :  { %v119_v39 = vadd.f32 %v118_v38, %v47_v37  ;;  %v389_v40 = vpop.f32.mrb[1].mxu0 }
  0xf4   :  { %v122_v41 = vmul.f32 0.05, %v119_v39 }
  0xf6   :  { %v123_v42 = vmax.f32 %v119_v39, %v122_v41 }
  0xf8   :  { %423 = vmatmul.mubr.f32.vlgmr.msra.gmra.mrb[0].mxu1 %v123_v42 }
 0x1cb   :  { %v210_v51 = vpop.f32.mrb[0].mxu1 }
 0x1cc   :  { %v211_v52 = vadd.f32 %v210_v51, %v143_v50  ;;  %v424_v53 = vpop.f32.mrb[1].mxu1 }
 0x1ce   :  { %214 = vadd.xlane.f32.xlu0 %v211_v52  ;;  %v216_v54 = vmul.f32 %v211_v52, %v211_v52 }
 0x1d2   :  { %217 = vadd.xlane.f32.xlu0 %v216_v54 }
 0x25b   :  { %v215_v10 = vpop.xlane.xlu0 %214 }
 0x25c   :  { %v219_v11 = vmul.f32 0.015625, %v215_v10 }
 0x25e   :  { %v221_v13 = vmul.f32 %v219_v11, %v219_v11  ;;  %v223_v17 = vsub.f32 %v211_v52, %v219_v11 }
 0x25f   :  { %v218_v12 = vpop.xlane.xlu0 %217 }
 0x260   :  { %v220_v14 = vmul.f32 0.015625, %v218_v12 }
 0x262   :  { %v222_v15 = vsub.f32 %v220_v14, %v221_v13 }
 0x264   :  { %v224_v16 = vadd.f32 1e-05, %v222_v15 }
 0x266   :  { %521 = vrsqrt.f32 %v224_v16 }
 0x270   :  { %v522_v18 = vpop.eup %521 }
 0x271   :  { %v226_v19 = vmul.f32 %v522_v18, %v223_v17 }
 0x273   :  { %458 = vmatmul.mubr.f32.vlgmr.msra.gmra.mrb[2].mxu0 %v226_v19 }
 0x346   :  { %v316_v21 = vpop.f32.mrb[2].mxu0 }
 0x347   :  { %v317_v22 = vadd.f32 %v339_v20, %v316_v21  ;;  %v459_v0 = vpop.f32.mrb[3].mxu0 }
 0x349   :  { %523 = vtanh.f32 %v317_v22 }
 0x353   :  { %v524_v23 = vpop.eup %523 }
 0x354   :  { %322 = vst.msk [vmem:[#allocation5] sm:$0xff] %vm321_vm2, %v524_v23 }
 0x355   :  { %558 = shalt.err (!%p555_p12)
}
 0x356   :  { %s559_s5 = scalar_lea.hbm %s771_s6, 128 }
 0x357   :  { %p560_p13 = scmp.ne.s32.totalorder %s771_s6, %s559_s5  ;;  %p563_p0 = scmp.lt.u32.totalorder %s559_s5, %s771_s6 }
 0x359   :  { %p565_p1 = pnand %p563_p0, %p560_p13 }
 0x35b   :  { %568 = shalt.err (!%p565_p1)
}
 0x35c   :  { %332 = dma.vmem_to_hbm [thread:$0]  %s330_s4, 128, %s771_s6, [#allocation4]  }
 0x35d   :  { %571 = dma.done.wait [#allocation4], 128  }
 0x35e   :  { %572 = vsyncadd [#allocation4], 4294967168 }
 0x35f   :  { %336 = vsyncpa [#allocation3], 1 }
 0x360   :  { %337 = vsyncpa [#allocation4], 1 }

// kernel: tpu_custom_call.1
= control target key start
LH: loop header
LB: loop body
LE: loop exit
PB: predicated region body
PF: predicated region fallthrough
CT: control target
= control target key end

     0   :  { %11 = vsyncpa [#allocation3], 0  ;;  %s765_s0 = inlined_call_operand.vmem [shape: f32[8,32], index: 0, kind: input, shape index: {}]   ;;  %s766_s1 = inlined_call_operand.hbm [shape: f32[32,128], index: 1, kind: input, shape index: {}]   ;;  %s767_s2 = inlined_call_operand.vmem [shape: f32[128,128], index: 2, kind: input, shape index: {}]   ;;  %s768_s3 = inlined_call_operand.vmem [shape: f32[128,16], index: 3, kind: input, shape index: {}]   ;;  %s769_s4 = inlined_call_operand.vmem [shape: f32[2,128], index: 4, kind: input, shape index: {}]   ;;  %s770_s5 = inlined_call_operand.vmem [shape: f32[1,16], index: 5, kind: input, shape index: {}]   ;;  %s771_s6 = inlined_call_operand.hbm [shape: f32[8,16], index: 6, kind: output, shape index: {}]  }
   0x1   :  { %12 = vsyncpa [#allocation4], 0  ;;  %s573_s21 = smov [#allocation2]   ;;  %s525_s25 = scalar_lea.hbm %s766_s1, 512 }
   0x2   :  { %s20_s22 = sshll.u32 %s573_s21, 4  ;;  %p526_p0 = scmp.ne.s32.totalorder %s766_s1, %s525_s25  ;;  %s21_s22 = int_to_ptr.vmem [resolvable:$true] %s20_s22 }
   0x3   :  { %p529_p1 = scmp.lt.u32.totalorder %s525_s25, %s766_s1 }
   0x5   :  { %p531_p2 = pnand %p529_p1, %p526_p0 }
   0x7   :  { %534 = shalt.err (!%p531_p2)
}
   0x8   :  { %s535_s30 = scalar_lea.vmem %s21_s22, 512  ;;  %p540_p4 = scmp.lt.s32.totalorder %s21_s22, %s21_s22 }
   0x9   :  { %p536_p3 = scmp.ne.s32.totalorder %s21_s22, %s535_s30  ;;  %p541_p5 = scmp.lt.s32.totalorder %s535_s30, %s535_s30 }
   0xb   :  { %p542_p6 = por %p541_p5, %p540_p4 }
   0xd   :  { %p543_p7 = pnand %p542_p6, %p536_p3 }
   0xf   :  { %546 = shalt.err (!%p543_p7)
}
  0x10   :  { %s574_s7 = smov 128   ;;  %s575_s8 = smov 8  }
  0x11   :  { %26 = dma.hbm_to_vmem [thread:$0]  %s766_s1, 512, %s21_s22, [#allocation3], %s574_s7, %s574_s7, %s575_s8  }
  0x12   :  { %569 = dma.done.wait [#allocation3], 512  }
  0x13   :  { %570 = vsyncadd [#allocation3], 4294966784  ;;  %v576_v0 = vmov 0.0|0.0   ;;  %vm577_vm0 = vmmov 0   ;;  %v578_v1 = vmov 0.0   ;;  %v40_v2 = vld [vmem:[#allocation2] sm:$0xff]  ;;  %v44_v33 = vlaneseq }
  0x14   :  { %460 = vmatprep.subr.bf16.mxu0 %v576_v0  ;;  %387 = vmatprep.mubr.msk.f32.mxu0 %vm577_vm0, %v578_v1  ;;  %v41_v3 = vld [vmem:[#allocation2 + $0x8] sm:$0xff]  ;;  %v42_v4 = vld [vmem:[#allocation2 + $0x10] sm:$0xff]  ;;  %v43_v6 = vld [vmem:[#allocation2 + $0x18] sm:$0xff]  ;;  %vm48_vm1 = vcmask 261120   ;;  %vm321_vm2 = vcmask 130048  }
  0x15   :  { %466 = vmatprep.subr.bf16.mxu1 %v576_v0  ;;  %422 = vmatprep.mubr.msk.f32.mxu1 %vm577_vm0, %v578_v1  ;;  %v461_v5 = vpack.c.bf16 %v41_v3, %v40_v2  ;;  %v124_v7 = vld [vmem:[%s767_s2] sm:$0xff]  ;;  %v125_v8 = vld [vmem:[%s767_s2 + $0x8] sm:$0xff]  ;;  %v126_v9 = vld [vmem:[%s767_s2 + $0x10] sm:$0xff]  ;;  %v464_v11 = vpack.c.bf16 %v43_v6, %v42_v4  ;;  %v45_v34 = vshrl.u32 %v44_v33, 7 }
  0x16   :  { %v127_v10 = vld [vmem:[%s767_s2 + $0x18] sm:$0xff]  ;;  %v467_v12 = vpack.c.bf16 %v125_v8, %v124_v7  ;;  %v128_v14 = vld [vmem:[%s767_s2 + $0x20] sm:$0xff]  ;;  %v129_v15 = vld [vmem:[%s767_s2 + $0x28] sm:$0xff] }
  0x17   :  { %462 = vmatpush3.bf16.msra.mxu0 %v461_v5  ;;  %v470_v13 = vpack.c.bf16 %v127_v10, %v126_v9  ;;  %v39_v16 = vld [vmem:[%s765_s0] sm:$0xff]  ;;  %v473_v17 = vpack.c.bf16 %v129_v15, %v128_v14  ;;  %v130_v18 = vld [vmem:[%s767_s2 + $0x30] sm:$0xff]  ;;  %v131_v19 = vld [vmem:[%s767_s2 + $0x38] sm:$0xff]  ;;  %v46_v35 = vsub.s32 0, %v45_v34  ;;  %v142_v49 = vsub.s32 1, %v45_v34 }
  0x18   :  { %463 = vmatprep.subr.bf16.mxu0 %v576_v0  ;;  %468 = vmatpush3.bf16.msra.mxu1 %v467_v12  ;;  %v476_v20 = vpack.c.bf16 %v131_v19, %v130_v18  ;;  %v132_v21 = vld [vmem:[%s767_s2 + $0x40] sm:$0xff]  ;;  %v133_v22 = vld [vmem:[%s767_s2 + $0x48] sm:$0xff]  ;;  %v134_v24 = vld [vmem:[%s767_s2 + $0x50] sm:$0xff] }
  0x19   :  { %469 = vmatprep.subr.bf16.mxu1 %v576_v0  ;;  %v479_v23 = vpack.c.bf16 %v133_v22, %v132_v21  ;;  %v135_v25 = vld [vmem:[%s767_s2 + $0x58] sm:$0xff]  ;;  %v136_v27 = vld [vmem:[%s767_s2 + $0x60] sm:$0xff]  ;;  %v137_v28 = vld [vmem:[%s767_s2 + $0x68] sm:$0xff] }
  0x1a   :  { %v482_v26 = vpack.c.bf16 %v135_v25, %v134_v24  ;;  %v485_v29 = vpack.c.bf16 %v137_v28, %v136_v27  ;;  %v138_v30 = vld [vmem:[%s767_s2 + $0x70] sm:$0xff]  ;;  %v139_v31 = vld [vmem:[%s767_s2 + $0x78] sm:$0xff]  ;;  %v38_v36 = vld [vmem:[%s769_s4] sm:$0x3] }
  0x1b   :  { %465 = vmatpush3.bf16.msra.mxu0 %v464_v11  ;;  %v488_v32 = vpack.c.bf16 %v139_v31, %v138_v30  ;;  %v47_v37 = vrot.slane %v38_v36, %v46_v35  ;;  %v227_v43 = vld [vmem:[%s768_s3] sm:$0xff]  ;;  %v228_v44 = vld [vmem:[%s768_s3 + $0x8] sm:$0xff]  ;;  %v229_v45 = vld [vmem:[%s768_s3 + $0x10] sm:$0xff]  ;;  %v143_v50 = vrot.slane %v38_v36, %v142_v49 }
  0x1c   :  { %490 = vmatprep.subr.bf16.mxu0 %v576_v0  ;;  %471 = vmatpush3.bf16.msra.mxu1 %v470_v13  ;;  %v491_v46 = vpack.c.bf16 %v228_v44, %v227_v43  ;;  %v230_v47 = vld [vmem:[%s768_s3 + $0x18] sm:$0xff]  ;;  %v231_v55 = vld [vmem:[%s768_s3 + $0x20] sm:$0xff]  ;;  %v232_v56 = vld [vmem:[%s768_s3 + $0x28] sm:$0xff] }
  0x1d   :  { %472 = vmatprep.subr.bf16.mxu1 %v576_v0  ;;  %v494_v48 = vpack.c.bf16 %v230_v47, %v229_v45  ;;  %v497_v57 = vpack.c.bf16 %v232_v56, %v231_v55  ;;  %v233_v58 = vld [vmem:[%s768_s3 + $0x30] sm:$0xff]  ;;  %v234_v59 = vld [vmem:[%s768_s3 + $0x38] sm:$0xff]  ;;  %v235_v61 = vld [vmem:[%s768_s3 + $0x40] sm:$0xff] }
  0x1e   :  { %388 = vmatmul.mubr.msk.f32.vlgmr.msra.gmra.mrb[0].mxu0 %vm48_vm1, %v39_v16  ;;  %v500_v60 = vpack.c.bf16 %v234_v59, %v233_v58  ;;  %v236_v62 = vld [vmem:[%s768_s3 + $0x48] sm:$0xff]  ;;  %v238_v2 = vld [vmem:[%s768_s3 + $0x58] sm:$0xff]  ;;  %v239_v4 = vld [vmem:[%s768_s3 + $0x60] sm:$0xff] }
  0x1f   :  { %457 = vmatprep.mubr.msk.f32.mxu0 %vm577_vm0, %v578_v1  ;;  %492 = vmatpush3.bf16.msra.mxu0 %v491_v46  ;;  %v503_v63 = vpack.c.bf16 %v236_v62, %v235_v61  ;;  %v237_v1 = vld [vmem:[%s768_s3 + $0x50] sm:$0xff]  ;;  %v240_v5 = vld [vmem:[%s768_s3 + $0x68] sm:$0xff]  ;;  %v242_v8 = vld [vmem:[%s768_s3 + $0x78] sm:$0xff] }
  0x20   :  { %474 = vmatpush3.bf16.msra.mxu1 %v473_v17  ;;  %493 = vmatprep.subr.bf16.mxu0 %v576_v0  ;;  %v506_v3 = vpack.c.bf16 %v238_v2, %v237_v1  ;;  %v509_v6 = vpack.c.bf16 %v240_v5, %v239_v4  ;;  %v241_v7 = vld [vmem:[%s768_s3 + $0x70] sm:$0xff]  ;;  %s579_s3 = smov [#allocation5]  }
  0x21   :  { %475 = vmatprep.subr.bf16.mxu1 %v576_v0  ;;  %v512_v9 = vpack.c.bf16 %v242_v8, %v241_v7  ;;  %s329_s4 = sshll.u32 %s579_s3, 4  ;;  %s330_s4 = int_to_ptr.vmem [resolvable:$true] %s329_s4 }
  0x22   :  { %s547_s25 = scalar_lea.vmem %s330_s4, 128  ;;  %p552_p9 = scmp.lt.s32.totalorder %s330_s4, %s330_s4 }
  0x23   :  { %495 = vmatpush3.bf16.msra.mxu0 %v494_v48  ;;  %p548_p8 = scmp.ne.s32.totalorder %s330_s4, %s547_s25  ;;  %p553_p10 = scmp.lt.s32.totalorder %s547_s25, %s547_s25 }
  0x24   :  { %477 = vmatpush3.bf16.msra.mxu1 %v476_v20  ;;  %496 = vmatprep.subr.bf16.mxu0 %v576_v0  ;;  %v339_v20 = vld [vmem:[%s770_s5] ss:$0 sm:$0xff] }
  0x25   :  { %478 = vmatprep.subr.bf16.mxu1 %v576_v0  ;;  %p554_p11 = por %p553_p10, %p552_p9 }
  0x27   :  { %498 = vmatpush3.bf16.msra.mxu0 %v497_v57  ;;  %p555_p12 = pnand %p554_p11, %p548_p8 }
  0x28   :  { %480 = vmatpush3.bf16.msra.mxu1 %v479_v23  ;;  %499 = vmatprep.subr.bf16.mxu0 %v576_v0 }
  0x29   :  { %481 = vmatprep.subr.bf16.mxu1 %v576_v0 }
  0x2b   :  { %501 = vmatpush3.bf16.msra.mxu0 %v500_v60 }
  0x2c   :  { %483 = vmatpush3.bf16.msra.mxu1 %v482_v26  ;;  %502 = vmatprep.subr.bf16.mxu0 %v576_v0 }
  0x2d   :  { %484 = vmatprep.subr.bf16.mxu1 %v576_v0 }
  0x2f   :  { %504 = vmatpush3.bf16.msra.mxu0 %v503_v63 }
  0x30   :  { %486 = vmatpush3.bf16.msra.mxu1 %v485_v29  ;;  %505 = vmatprep.subr.bf16.mxu0 %v576_v0 }
  0x31   :  { %487 = vmatprep.subr.bf16.mxu1 %v576_v0 }
  0x33   :  { %507 = vmatpush3.bf16.msra.mxu0 %v506_v3 }
  0x34   :  { %489 = vmatpush3.bf16.msra.mxu1 %v488_v32  ;;  %508 = vmatprep.subr.bf16.mxu0 %v576_v0 }
  0x37   :  { %510 = vmatpush3.bf16.msra.mxu0 %v509_v6 }
  0x38   :  { %511 = vmatprep.subr.bf16.mxu0 %v576_v0 }
  0x3b   :  { %513 = vmatpush3.bf16.msra.mxu0 %v512_v9 }
  0xf1   :  { %v118_v38 = vpop.f32.mrb[0].mxu0 }
  0xf2   :  { %v119_v39 = vadd.f32 %v118_v38, %v47_v37  ;;  %v389_v40 = vpop.f32.mrb[1].mxu0 }
  0xf4   :  { %v122_v41 = vmul.f32 0.05, %v119_v39 }
  0xf6   :  { %v123_v42 = vmax.f32 %v119_v39, %v122_v41 }
  0xf8   :  { %423 = vmatmul.mubr.f32.vlgmr.msra.gmra.mrb[0].mxu1 %v123_v42 }
 0x1cb   :  { %v210_v51 = vpop.f32.mrb[0].mxu1 }
 0x1cc   :  { %v211_v52 = vadd.f32 %v210_v51, %v143_v50  ;;  %v424_v53 = vpop.f32.mrb[1].mxu1 }
 0x1ce   :  { %214 = vadd.xlane.f32.xlu0 %v211_v52  ;;  %v216_v54 = vmul.f32 %v211_v52, %v211_v52 }
 0x1d2   :  { %217 = vadd.xlane.f32.xlu0 %v216_v54 }
 0x25b   :  { %v215_v10 = vpop.xlane.xlu0 %214 }
 0x25c   :  { %v219_v11 = vmul.f32 0.015625, %v215_v10 }
 0x25e   :  { %v221_v13 = vmul.f32 %v219_v11, %v219_v11  ;;  %v223_v17 = vsub.f32 %v211_v52, %v219_v11 }
 0x25f   :  { %v218_v12 = vpop.xlane.xlu0 %217 }
 0x260   :  { %v220_v14 = vmul.f32 0.015625, %v218_v12 }
 0x262   :  { %v222_v15 = vsub.f32 %v220_v14, %v221_v13 }
 0x264   :  { %v224_v16 = vadd.f32 1e-05, %v222_v15 }
 0x266   :  { %521 = vrsqrt.f32 %v224_v16 }
 0x270   :  { %v522_v18 = vpop.eup %521 }
 0x271   :  { %v226_v19 = vmul.f32 %v522_v18, %v223_v17 }
 0x273   :  { %458 = vmatmul.mubr.f32.vlgmr.msra.gmra.mrb[2].mxu0 %v226_v19 }
 0x346   :  { %v316_v21 = vpop.f32.mrb[2].mxu0 }
 0x347   :  { %v317_v22 = vadd.f32 %v339_v20, %v316_v21  ;;  %v459_v0 = vpop.f32.mrb[3].mxu0 }
 0x349   :  { %523 = vtanh.f32 %v317_v22 }
 0x353   :  { %v524_v23 = vpop.eup %523 }
 0x354   :  { %322 = vst.msk [vmem:[#allocation5] sm:$0xff] %vm321_vm2, %v524_v23 }
 0x355   :  { %558 = shalt.err (!%p555_p12)
}
 0x356   :  { %s559_s5 = scalar_lea.hbm %s771_s6, 128 }
 0x357   :  { %p560_p13 = scmp.ne.s32.totalorder %s771_s6, %s559_s5  ;;  %p563_p0 = scmp.lt.u32.totalorder %s559_s5, %s771_s6 }
 0x359   :  { %p565_p1 = pnand %p563_p0, %p560_p13 }
 0x35b   :  { %568 = shalt.err (!%p565_p1)
}
 0x35c   :  { %332 = dma.vmem_to_hbm [thread:$0]  %s330_s4, 128, %s771_s6, [#allocation4]  }
 0x35d   :  { %571 = dma.done.wait [#allocation4], 128  }
 0x35e   :  { %572 = vsyncadd [#allocation4], 4294967168 }
 0x35f   :  { %336 = vsyncpa [#allocation3], 1 }
 0x360   :  { %337 = vsyncpa [#allocation4], 1 }

</bundles_post_ra>
